<compile_context>
chip_gen: v5e
topology: v5e:2x2
jax: 0.10.0
libtpu: 0.0.40
codegen_flags: <defaults>
</compile_context>

<pallas_src>
import jax
import jax.numpy as jnp
from jax import lax
from jax.experimental import pallas as pl
from jax.experimental.pallas import tpu as pltpu

_reduction_modes = ["none", "mean", "sum"]

_TARGET_BLOCK_BYTES = 2 * 1024 * 1024     # ~2 MiB per input block (safe on v7x 64 MiB VMEM)
_VMEM_LIMIT_BYTES = 48 * 1024 * 1024      # safe on v5e/v6e (128 MiB) and v7x (64 MiB)
_SMALL_NUMEL_FASTPATH = 1 << 20           # below this, fused XLA beats Pallas-call overhead


# ---------------- layout helpers (all trace-time Python, no device copies) ----------------

def _pick_cols(numel):
    """Largest lane-dense width such that rows = numel // cols is a multiple of 8."""
    for cols in (512, 256, 128):
        if numel % (8 * cols) == 0:
            return cols
    return None


def _sublane_granularity(dtype):
    return {4: 8, 2: 16, 1: 32}.get(jnp.dtype(dtype).itemsize, 8)


def _pick_tile_rows(rows, cols, dtypes, target_block_bytes):
    gran = max(_sublane_granularity(d) for d in dtypes)          # covers narrowest dtype packing
    itemsize = max(jnp.dtype(d).itemsize for d in dtypes)
    max_rows = max(gran, (target_block_bytes // (cols * itemsize)) // gran * gran)
    if rows <= max_rows:
        return rows            # block == full array dims: always layout-legal; rows % 8 == 0
    return max_rows            # multiple of gran (>= 8): satisfies (8,128)/packing tiling


# ---------------- kernels ----------------

def _make_sum_kernel(*, weighted, rows, tile_rows, cols, k_per_slab, ragged):
    """Resident-accumulator partial sum of |pred - target| (optionally * weight)."""
    def kernel(*refs):
        if weighted:
            pred_ref, target_ref, w_ref, out_ref, acc_ref = refs
        else:
            pred_ref, target_ref, out_ref, acc_ref = refs
            w_ref = None
        s = pl.program_id(0)           # parallel slab axis (megacore on v7x)
        k = pl.program_id(1)           # arbitrary reduction axis

        @pl.when(k == 0)
        def _init():
            acc_ref[...] = jnp.zeros_like(acc_ref)

        d = jnp.abs(pred_ref[...].astype(jnp.float32)
                    - target_ref[...].astype(jnp.float32))
        if weighted:
            d = d * w_ref[...].astype(jnp.float32)
        if ragged:
            # Mask rows beyond the logical array extent (OOB reads are unspecified,
            # clamped index_map may re-read valid rows): VPU has plenty of slack.
            row0 = (s * k_per_slab + k) * tile_rows
            rid = lax.broadcasted_iota(jnp.int32, (tile_rows, cols), 0) + row0
            d = jnp.where(rid < rows, d, 0.0)
        # Fold sublane groups (VPU adds only, no per-step XLU reduce).
        acc_ref[...] += d.reshape(tile_rows // 8, 8, cols).sum(axis=0)

        @pl.when(k == k_per_slab - 1)
        def _flush():
            out_ref[...] = acc_ref[...][None]
    return kernel


def _make_none_kernel(*, weighted, loss_weight):
    """Elementwise |pred - target| (optionally * weight), loss_weight folded in."""
    lw = float(loss_weight)

    def kernel(*refs):
        if weighted:
            pred_ref, target_ref, w_ref, out_ref = refs
        else:
            pred_ref, target_ref, out_ref = refs
            w_ref = None
        d = jnp.abs(pred_ref[...].astype(jnp.float32)
                    - target_ref[...].astype(jnp.float32))
        if weighted:
            d = d * w_ref[...].astype(jnp.float32)
        if lw != 1.0:
            d = d * jnp.float32(lw)
        out_ref[...] = d.astype(out_ref.dtype)
    return kernel


# ---------------- pallas_call wrappers ----------------

def _l1_sum_pallas(pred, target, weight, cols, target_block_bytes=_TARGET_BLOCK_BYTES):
    """sum(|pred - target|) (optionally weighted) as a scalar f32 — no input copies."""
    numel = pred.size
    rows = numel // cols
    dtypes = [pred.dtype, target.dtype] + ([weight.dtype] if weight is not None else [])
    tile_rows = _pick_tile_rows(rows, cols, dtypes, target_block_bytes)
    nblk = pl.cdiv(rows, tile_rows)
    num_slabs = 2 if nblk >= 2 else 1              # megacore-friendly on v7x, harmless elsewhere
    kps = pl.cdiv(nblk, num_slabs)
    ragged = (num_slabs * kps * tile_rows) != rows

    def in_map(s, k):
        # Clamp fully-out-of-range blocks (their contribution is masked in-kernel).
        return (jnp.minimum(s * kps + k, nblk - 1), 0)

    in_spec = pl.BlockSpec((tile_rows, cols), in_map)
    out_spec = pl.BlockSpec((1, 8, cols), lambda s, k: (s, 0, 0))

    args = [pred.reshape(rows, cols), target.reshape(rows, cols)]   # free reshapes
    in_specs = [in_spec, in_spec]
    if weight is not None:
        args.append(weight.reshape(rows, cols))
        in_specs.append(in_spec)

    kernel = _make_sum_kernel(weighted=weight is not None, rows=rows,
                              tile_rows=tile_rows, cols=cols,
                              k_per_slab=kps, ragged=ragged)

    partials = pl.pallas_call(
        kernel,
        out_shape=jax.ShapeDtypeStruct((num_slabs, 8, cols), jnp.float32),
        grid_spec=pltpu.PrefetchScalarGridSpec(
            num_scalar_prefetch=0,
            grid=(num_slabs, kps),
            in_specs=in_specs,
            out_specs=out_spec,
            scratch_shapes=[pltpu.VMEM((8, cols), jnp.float32)]),
        compiler_params=pltpu.CompilerParams(
            dimension_semantics=("parallel", "arbitrary"),
            vmem_limit_bytes=_VMEM_LIMIT_BYTES),
    )(*args)
    # Tiny (num_slabs, 8, cols) slab; final reduce in JAX is negligible.
    return jnp.sum(partials)


def _l1_none_pallas(pred, target, weight, loss_weight, cols,
                    target_block_bytes=_TARGET_BLOCK_BYTES):
    """loss_weight * |pred - target| (* weight) with the original shape — no copies."""
    shape = pred.shape
    numel = pred.size
    rows = numel // cols
    dtypes = [pred.dtype, target.dtype] + ([weight.dtype] if weight is not None else [])
    tile_rows = _pick_tile_rows(rows, cols, dtypes, target_block_bytes)
    nblk = pl.cdiv(rows, tile_rows)

    tile_spec = pl.BlockSpec((tile_rows, cols), lambda i: (i, 0))

    args = [pred.reshape(rows, cols), target.reshape(rows, cols)]
    in_specs = [tile_spec, tile_spec]
    if weight is not None:
        args.append(weight.reshape(rows, cols))
        in_specs.append(tile_spec)

    kernel = _make_none_kernel(weighted=weight is not None, loss_weight=loss_weight)

    out2d = pl.pallas_call(
        kernel,
        out_shape=jax.ShapeDtypeStruct((rows, cols), pred.dtype),
        grid_spec=pltpu.PrefetchScalarGridSpec(
            num_scalar_prefetch=0,
            grid=(nblk,),
            in_specs=in_specs,
            out_specs=tile_spec),
        compiler_params=pltpu.CompilerParams(
            dimension_semantics=("parallel",),
            vmem_limit_bytes=_VMEM_LIMIT_BYTES),
    )(*args)
    return out2d.reshape(shape)   # rows*cols == numel exactly → free reshape, no slice


# ---------------- pure-JAX fast path (tiny / non-tileable sizes) ----------------

def _l1_loss_jnp(pred, target, weight, reduction, loss_weight):
    d = jnp.abs(pred.astype(jnp.float32) - target.astype(jnp.float32))
    if weight is not None:
        d = d * weight.astype(jnp.float32)
    if reduction == "none":
        return (jnp.float32(loss_weight) * d).astype(pred.dtype)
    total = jnp.sum(d)
    if reduction == "mean":
        total = total / jnp.float32(pred.size)
    return (jnp.float32(loss_weight) * total).astype(pred.dtype)


# ---------------- module ----------------

class L1Loss:
    """JAX/Pallas equivalent of the PyTorch L1Loss module (forward only)."""

    def __init__(self, loss_weight=1.0, reduction="mean",
                 min_pallas_numel=_SMALL_NUMEL_FASTPATH):
        if reduction not in _reduction_modes:
            raise ValueError(
                f"Unsupported reduction mode: {reduction}. "
                f"Supported ones are: {_reduction_modes}")
        self.loss_weight = float(loss_weight)
        self.reduction = reduction
        self.min_pallas_numel = min_pallas_numel

    def __call__(self, pred, target, weight=None, **kwargs):
        assert pred.shape == target.shape, "pred/target shape mismatch"
        if weight is not None and weight.shape != pred.shape:
            weight = jnp.broadcast_to(weight, pred.shape)   # basicsr-style (N,C,1,1) weights

        cols = _pick_cols(pred.size)
        if cols is None or pred.size < self.min_pallas_numel:
            # Tiny tensors, or sizes not divisible by 8*128 (Pallas path would need a
            # padding copy): XLA's fused elementwise+reduce is the better choice.
            return _l1_loss_jnp(pred, target, weight, self.reduction, self.loss_weight)

        if self.reduction == "none":
            return _l1_none_pallas(pred, target, weight, self.loss_weight, cols)

        total = _l1_sum_pallas(pred, target, weight, cols)
        if self.reduction == "mean":
            # NOTE: basicsr weighted-mean convention (divide by numel, NOT sum(weight)).
            total = total / jnp.float32(pred.size)
        return (jnp.float32(self.loss_weight) * total).astype(pred.dtype)


if __name__ == "__main__":
    key = jax.random.PRNGKey(0)
    k1, k2, k3 = jax.random.split(key, 3)
    # Small (N, C, H, W) shapes consistent with the forward convention.
    pred = jax.random.normal(k1, (2, 4, 16, 16), dtype=jnp.float32)
    target = jax.random.normal(k2, (2, 4, 16, 16), dtype=jnp.float32)
    weight = jax.random.uniform(k3, (2, 4, 16, 16), dtype=jnp.float32)

    ref_mean = jnp.mean(jnp.abs(pred - target))

    # 1. Default module (small-input jnp fast path), mean.
    loss = L1Loss(1.0, "mean")(pred, target)
    jax.block_until_ready(loss)
    assert jnp.allclose(loss, ref_mean, rtol=1e-5, atol=1e-6), (loss, ref_mean)

    # 2. Forced Pallas path, mean (unweighted).
    loss_p = L1Loss(1.0, "mean", min_pallas_numel=0)(pred, target)
    jax.block_until_ready(loss_p)
    assert jnp.allclose(loss_p, ref_mean, rtol=1e-5, atol=1e-6), (loss_p, ref_mean)

    # 3. Forced Pallas path, sum (weighted).
    loss_s = L1Loss(0.5, "sum", min_pallas_numel=0)(pred, target, weight)
    jax.block_until_ready(loss_s)
    ref_s = 0.5 * jnp.sum(jnp.abs(pred - target) * weight)
    assert jnp.allclose(loss_s, ref_s, rtol=1e-5, atol=1e-4), (loss_s, ref_s)

    # 4. Forced Pallas path, 'none' (weighted, loss_weight folded into the kernel).
    loss_n = L1Loss(2.0, "none", min_pallas_numel=0)(pred, target, weight)
    jax.block_until_ready(loss_n)
    ref_n = 2.0 * jnp.abs(pred - target) * weight
    assert loss_n.shape == pred.shape
    assert jnp.allclose(loss_n, ref_n, rtol=1e-5, atol=1e-6)

    # 5. Multi-block / ragged / two-slab accumulator coverage (small blocks forced).
    p2 = jax.random.normal(k1, (2, 4, 24, 64), dtype=jnp.float32)
    t2 = jax.random.normal(k2, (2, 4, 24, 64), dtype=jnp.float32)
    w2 = jax.random.uniform(k3, (2, 4, 24, 64), dtype=jnp.float32)
    s2 = _l1_sum_pallas(p2, t2, w2, cols=512, target_block_bytes=16 * 1024)
    jax.block_until_ready(s2)
    ref2 = jnp.sum(jnp.abs(p2 - t2) * w2)
    assert jnp.allclose(s2, ref2, rtol=1e-5, atol=1e-4), (s2, ref2)
    n2 = _l1_none_pallas(p2, t2, None, 1.0, cols=512, target_block_bytes=16 * 1024)
    jax.block_until_ready(n2)
    assert jnp.allclose(n2, jnp.abs(p2 - t2), rtol=1e-5, atol=1e-6)

    print("KERNEL_OK")
</pallas_src>

<mosaic_0001>
module attributes {stable_mosaic.version = 11 : i64} {
  func.func @kernel(%arg0: i32, %arg1: i32, %arg2: memref<8x256xf32, #tpu.memory_space<vmem>>, %arg3: memref<8x256xf32, #tpu.memory_space<vmem>>, %arg4: memref<1x8x256xf32, #tpu.memory_space<vmem>>, %arg5: memref<8x256xf32, #tpu.memory_space<vmem>>) attributes {dimension_semantics = [#tpu.dimension_semantics<parallel>, #tpu.dimension_semantics<arbitrary>], iteration_bounds = array<i64: 1, 1>, scalar_prefetch = 0 : i64, scratch_operands = 1 : i64, tpu.core_type = #tpu.core_type<tc>, window_params = [{transform_indices = @transform_0, window_bounds = array<i64: 8, 256>}, {transform_indices = @transform_1, window_bounds = array<i64: 8, 256>}, {transform_indices = @transform_2, window_bounds = array<i64: 1, 8, 256>}]} {
    %c0_i32 = arith.constant 0 : i32
    %0 = arith.cmpi eq, %arg1, %c0_i32 : i32
    %1 = arith.extui %0 : i1 to i32
    %c0_i32_0 = arith.constant 0 : i32
    %2 = arith.cmpi ne, %1, %c0_i32_0 : i32
    scf.if %2 {
      %cst_10 = arith.constant 0.000000e+00 : f32
      %15 = vector.broadcast %cst_10 : f32 to vector<8x256xf32>
      %c0_11 = arith.constant 0 : index
      %c0_12 = arith.constant 0 : index
      %16 = vector.load %arg5[%c0_11, %c0_12] : memref<8x256xf32, #tpu.memory_space<vmem>>, vector<8x256xf32>
      tpu.vector_store %arg5[%c0_11, %c0_12], %15 {strides = array<i32>} : memref<8x256xf32, #tpu.memory_space<vmem>>, vector<8x256xf32>,
    } else {
    }
    %c0 = arith.constant 0 : index
    %c0_1 = arith.constant 0 : index
    %3 = vector.load %arg2[%c0, %c0_1] : memref<8x256xf32, #tpu.memory_space<vmem>>, vector<8x256xf32>
    %c0_2 = arith.constant 0 : index
    %c0_3 = arith.constant 0 : index
    %4 = vector.load %arg3[%c0_2, %c0_3] : memref<8x256xf32, #tpu.memory_space<vmem>>, vector<8x256xf32>
    %5 = arith.subf %3, %4 : vector<8x256xf32>
    %6 = math.absf %5 : vector<8x256xf32>
    %c0_4 = arith.constant 0 : index
    %c0_5 = arith.constant 0 : index
    %7 = vector.load %arg5[%c0_4, %c0_5] : memref<8x256xf32, #tpu.memory_space<vmem>>, vector<8x256xf32>
    %8 = vector.shape_cast %6 : vector<8x256xf32> to vector<1x8x256xf32>
    %cst = arith.constant dense<0.000000e+00> : vector<8x256xf32>
    %9 = vector.multi_reduction <add>, %8, %cst [0] : vector<1x8x256xf32> to vector<8x256xf32>
    %10 = arith.addf %7, %9 : vector<8x256xf32>
    %c0_6 = arith.constant 0 : index
    %c0_7 = arith.constant 0 : index
    %11 = vector.load %arg5[%c0_6, %c0_7] : memref<8x256xf32, #tpu.memory_space<vmem>>, vector<8x256xf32>
    tpu.vector_store %arg5[%c0_6, %c0_7], %10 {strides = array<i32>} : memref<8x256xf32, #tpu.memory_space<vmem>>, vector<8x256xf32>,
    %c0_i32_8 = arith.constant 0 : i32
    %12 = arith.cmpi eq, %arg1, %c0_i32_8 : i32
    %13 = arith.extui %12 : i1 to i32
    %c0_i32_9 = arith.constant 0 : i32
    %14 = arith.cmpi ne, %13, %c0_i32_9 : i32
    scf.if %14 {
      %c0_10 = arith.constant 0 : index
      %c0_11 = arith.constant 0 : index
      %15 = vector.load %arg5[%c0_10, %c0_11] : memref<8x256xf32, #tpu.memory_space<vmem>>, vector<8x256xf32>
      %16 = vector.shape_cast %15 : vector<8x256xf32> to vector<1x8x256xf32>
      %c0_12 = arith.constant 0 : index
      %c0_13 = arith.constant 0 : index
      %c0_14 = arith.constant 0 : index
      %17 = vector.load %arg4[%c0_12, %c0_13, %c0_14] : memref<1x8x256xf32, #tpu.memory_space<vmem>>, vector<1x8x256xf32>
      tpu.vector_store %arg4[%c0_12, %c0_13, %c0_14], %16 {strides = array<i32>} : memref<1x8x256xf32, #tpu.memory_space<vmem>>, vector<1x8x256xf32>,
    } else {
    }
    return
  }
  func.func @transform_0(%arg0: i32, %arg1: i32) -> (i32, i32) {
    %c1_i32 = arith.constant 1 : i32
    %0 = arith.muli %arg0, %c1_i32 : i32
    %1 = arith.addi %0, %arg1 : i32
    %c0_i32 = arith.constant 0 : i32
    %2 = arith.minsi %1, %c0_i32 : i32
    %c0_i32_0 = arith.constant 0 : i32
    %c0_i32_1 = arith.constant 0 : i32
    return %2, %c0_i32_0 : i32, i32
  }
  func.func @transform_1(%arg0: i32, %arg1: i32) -> (i32, i32) {
    %c1_i32 = arith.constant 1 : i32
    %0 = arith.muli %arg0, %c1_i32 : i32
    %1 = arith.addi %0, %arg1 : i32
    %c0_i32 = arith.constant 0 : i32
    %2 = arith.minsi %1, %c0_i32 : i32
    %c0_i32_0 = arith.constant 0 : i32
    %c0_i32_1 = arith.constant 0 : i32
    return %2, %c0_i32_0 : i32, i32
  }
  func.func @transform_2(%arg0: i32, %arg1: i32) -> (i32, i32, i32) {
    %c0_i32 = arith.constant 0 : i32
    %c0_i32_0 = arith.constant 0 : i32
    %c0_i32_1 = arith.constant 0 : i32
    return %arg0, %c0_i32, %c0_i32_0 : i32, i32, i32
  }
}

</mosaic_0001>

<bundles_post_ra>
// kernel: tpu_custom_call.1
= control target key start
LH: loop header
LB: loop body
LE: loop exit
PB: predicated region body
PF: predicated region fallthrough
CT: control target
= control target key end

     0   :  { %7 = vsyncpa [#allocation4], 0  ;;  %s217_s0 = inlined_call_operand.hbm [shape: f32[8,256], index: 0, kind: input, shape index: {}]   ;;  %s218_s1 = inlined_call_operand.hbm [shape: f32[8,256], index: 1, kind: input, shape index: {}]   ;;  %s219_s2 = inlined_call_operand.hbm [shape: f32[1,8,256], index: 2, kind: output, shape index: {}]  }
   0x1   :  { %8 = vsyncpa [#allocation7], 0 }
   0x2   :  { %9 = vsyncpa [#allocation5], 0  ;;  %s21_s11 = sshll.u32 %s217_s0, 4  ;;  %s190_s12 = smov [#allocation3]   ;;  %s22_s11 = int_to_ptr.hbm [resolvable:$true] %s21_s11 }
   0x3   :  { %s23_s13 = sshll.u32 %s190_s12, 4  ;;  %s38_s16 = sshll.u32 %s218_s1, 4  ;;  %s24_s13 = int_to_ptr.vmem [resolvable:$true] %s23_s13  ;;  %s39_s16 = int_to_ptr.hbm [resolvable:$true] %s38_s16 }
   0x4   :  { %26 = dma.hbm_to_vmem [thread:$0]  %s22_s11, 256, %s24_s13, [#allocation4]  }
   0x5   :  { %s191_s17 = smov [#allocation6]  }
   0x6   :  { %s40_s18 = sshll.u32 %s191_s17, 4  ;;  %s41_s18 = int_to_ptr.vmem [resolvable:$true] %s40_s18 }
   0x7   :  { %43 = dma.hbm_to_vmem [thread:$0]  %s39_s16, 256, %s41_s18, [#allocation7]  }
   0x8   :  { %184 = dma.done.wait [#allocation4], 256  }
   0x9   :  { %185 = vsyncadd [#allocation4], 4294967040 }
   0xa   :  { %186 = dma.done.wait [#allocation7], 256  }
   0xb   :  { %187 = vsyncadd [#allocation7], 4294967040  ;;  %v64_v0 = vld [vmem:[#allocation3] sm:$0xff]  ;;  %v66_v1 = vld [vmem:[#allocation6] sm:$0xff]  ;;  %s192_s0 = smov [#allocation8]   ;;  %s94_s1 = sshll.u32 %s219_s2, 4  ;;  %s95_s1 = int_to_ptr.hbm [resolvable:$true] %s94_s1 }
   0xc   :  { %v65_v2 = vld [vmem:[#allocation3 + $0x8] sm:$0xff]  ;;  %v68_v3 = vsub.f32 %v64_v0, %v66_v1  ;;  %v67_v4 = vld [vmem:[#allocation6 + $0x8] sm:$0xff]  ;;  %s92_s19 = sshll.u32 %s192_s0, 4  ;;  %s93_s19 = int_to_ptr.vmem [resolvable:$true] %s92_s19 }
   0xd   :  { %v69_v5 = vsub.f32 %v65_v2, %v67_v4 }
   0xe   :  { %v70_v6 = vand.u32 2147483647, %v68_v3 }
   0xf   :  { %v71_v7 = vand.u32 2147483647, %v69_v5 }
  0x10   :  { %85 = vst [vmem:[#allocation8] sm:$0xff] %v70_v6 }
  0x11   :  { %86 = vst [vmem:[#allocation8 + $0x8] sm:$0xff] %v71_v7 }
  0x12   :  { %97 = dma.vmem_to_hbm [thread:$0]  %s93_s19, 256, %s95_s1, [#allocation5]  }
  0x13   :  { %188 = dma.done.wait [#allocation5], 256  }
  0x14   :  { %189 = vsyncadd [#allocation5], 4294967040 }
  0x15   :  { %102 = vsyncpa [#allocation4], 1 }
  0x16   :  { %103 = vsyncpa [#allocation7], 1 }
  0x17   :  { %104 = vsyncpa [#allocation5], 1 }

</bundles_post_ra>
